<compile_context>
chip_gen: v7x
topology: tpu7x:2x2x1
jax: 0.10.0
libtpu: 0.0.40
codegen_flags: <defaults>
</compile_context>

<pallas_src>
import math

import jax
import jax.numpy as jnp
from jax.experimental import pallas as pl
from jax.experimental.pallas import tpu as pltpu


# ---------------------------------------------------------------------------
# Kernels
# ---------------------------------------------------------------------------

def _encode_decode_tile(x_ref, w_enc_ref, b_enc_ref, thr_ref, w_dec_ref):
    """f32 contribution of one d_sae tile to the reconstruction."""
    # encode: (block_b, d_model) @ (d_model, block_s), f32 accumulation
    pre = jnp.dot(x_ref[...], w_enc_ref[...],
                  preferred_element_type=jnp.float32)
    pre = pre + b_enc_ref[...].astype(jnp.float32)
    # JumpReLU: mask * relu(pre) == where(pre > max(thr, 0), pre, 0)
    # (max(thr, 0) is computed on the (1, block_s) row, not per element).
    thr_pos = jnp.maximum(thr_ref[...].astype(jnp.float32), 0.0)
    acts = jnp.where(pre > thr_pos, pre, 0.0)
    # decode: (block_b, block_s) @ (block_s, d_model), f32 accumulation
    return jnp.dot(acts.astype(w_dec_ref.dtype), w_dec_ref[...],
                   preferred_element_type=jnp.float32)


def _kernel_f32_out(x_ref, w_enc_ref, b_enc_ref, thr_ref, w_dec_ref,
                    b_dec_ref, o_ref):
    """f32 output: accumulate directly into the resident output tile."""
    k = pl.program_id(1)
    contrib = _encode_decode_tile(x_ref, w_enc_ref, b_enc_ref, thr_ref,
                                  w_dec_ref)

    @pl.when(k == 0)
    def _init():
        o_ref[...] = contrib

    @pl.when(k > 0)
    def _accum():
        o_ref[...] += contrib

    @pl.when(k == pl.num_programs(1) - 1)
    def _finalize():
        o_ref[...] += b_dec_ref[...].astype(jnp.float32)


def _kernel_acc_scratch(x_ref, w_enc_ref, b_enc_ref, thr_ref, w_dec_ref,
                        b_dec_ref, o_ref, acc_ref):
    """Non-f32 output: f32 VMEM accumulator, single cast + store at the end."""
    k = pl.program_id(1)
    contrib = _encode_decode_tile(x_ref, w_enc_ref, b_enc_ref, thr_ref,
                                  w_dec_ref)

    @pl.when(k == 0)
    def _init():
        acc_ref[...] = contrib

    @pl.when(k > 0)
    def _accum():
        acc_ref[...] += contrib

    @pl.when(k == pl.num_programs(1) - 1)
    def _finalize():
        o_ref[...] = (acc_ref[...]
                      + b_dec_ref[...].astype(jnp.float32)).astype(o_ref.dtype)


# ---------------------------------------------------------------------------
# Block-size selection (per-generation VMEM budget)
# ---------------------------------------------------------------------------

def _round_up(x, m):
    return ((x + m - 1) // m) * m


def _vmem_capacity_bytes():
    try:
        return int(pltpu.get_tpu_info().vmem_capacity_bytes)
    except Exception:
        return 64 * 1024 * 1024          # conservative (v7x-sized) fallback


def _select_blocks(B, d_model, d_sae, x_bytes, w_bytes, out_bytes, sub,
                   declared_cap):
    """Pick (block_b, block_s) from a VMEM budget.

    block_s bounds the streamed (double-buffered) W_enc / W_dec tiles;
    block_b sets how many rows reuse each streamed weight byte (arithmetic
    intensity ~ block_b FLOPs / weight byte), so everything left over goes
    to block_b.
    """
    budget = int(declared_cap * 0.85)               # headroom for internal scratch

    # --- block_s: double-buffered W_enc + W_dec tiles within ~40% of budget
    w_tile_budget = int(budget * 0.40)
    bs = w_tile_budget // max(4 * d_model * w_bytes, 1)   # 2 arrays x 2 buffers
    bs = max(128, (bs // 128) * 128)
    bs = min(bs, 2048)
    block_s = min(bs, _round_up(d_sae, 128))
    # keep the MXU K/N dim >= 256 when d_sae allows and it still fits
    if block_s < 256 <= d_sae and 4 * d_model * 256 * w_bytes <= int(budget * 0.6):
        block_s = 256

    # --- block_b: all remaining VMEM (resident x / out / acc + f32 temps)
    w_tile_bytes = 4 * d_model * block_s * w_bytes
    rem = max(budget - w_tile_bytes, 0)
    per_row = (d_model * (2 * x_bytes + 2 * out_bytes + 4)   # x, out (2 bufs), acc
               + block_s * (8 + w_bytes))                    # pre/acts/acts-cast temps
    bb = max(sub, rem // max(per_row, 1))
    if bb >= 128:
        bb = min(1024, (bb // 128) * 128)
    else:
        bb = max(sub, (bb // sub) * sub)

    B_pad0 = _round_up(B, sub)
    if bb >= B_pad0:
        block_b = B_pad0
        # for large batches keep >= 2 batch tiles so the "parallel" axis can
        # shard across TensorCores (v7x has 2 TCs per chip)
        if B_pad0 >= 512 and (B_pad0 // 2) % sub == 0:
            block_b = B_pad0 // 2
    else:
        block_b = bb
    return int(block_b), int(block_s)


# ---------------------------------------------------------------------------
# Wrapper
# ---------------------------------------------------------------------------

def jumprelu_sae_forward(x, w_enc, b_enc, threshold, w_dec, b_dec,
                         *, block_b=None, block_s=None, weights_dtype=None):
    """x: [B, d_model] -> recon: [B, d_model] (in x's dtype).

    weights_dtype: optionally cast weights / biases / threshold (e.g.
    jnp.bfloat16) to halve weight HBM traffic; accumulation stays f32.
    """
    B, d_model = x.shape
    d_sae = w_enc.shape[1]
    out_dtype = x.dtype

    if weights_dtype is not None:
        w_enc = w_enc.astype(weights_dtype)
        w_dec = w_dec.astype(weights_dtype)
        b_enc = b_enc.astype(weights_dtype)
        b_dec = b_dec.astype(weights_dtype)
        threshold = threshold.astype(weights_dtype)
    w_dtype = w_enc.dtype

    # Hoist the x -> weight-dtype cast out of the per-k kernel body.
    x_in = x if x.dtype == w_dtype else x.astype(w_dtype)

    x_bytes = jnp.dtype(x_in.dtype).itemsize
    w_bytes = jnp.dtype(w_dtype).itemsize
    out_bytes = jnp.dtype(out_dtype).itemsize
    sub = {4: 8, 2: 16, 1: 32}.get(x_bytes, 8)       # sublane multiple

    vmem_cap = _vmem_capacity_bytes()
    declared_cap = min(int(vmem_cap * 0.8), 100 * 1024 * 1024)

    auto_b, auto_s = _select_blocks(B, d_model, d_sae, x_bytes, w_bytes,
                                    out_bytes, sub, declared_cap)
    if block_b is None:
        block_b = auto_b
    if block_s is None:
        block_s = auto_s

    # Zero-pad batch / d_sae to tile multiples (exact: padded features give
    # pre = 0, threshold = 0 -> acts = 0; padded rows are sliced off).
    B_pad = _round_up(B, block_b)
    S_pad = _round_up(d_sae, block_s)
    if B_pad != B:
        x_in = jnp.pad(x_in, ((0, B_pad - B), (0, 0)))
    if S_pad != d_sae:
        ps = S_pad - d_sae
        w_enc = jnp.pad(w_enc, ((0, 0), (0, ps)))
        w_dec = jnp.pad(w_dec, ((0, ps), (0, 0)))
        b_enc = jnp.pad(b_enc, ((0, ps),))
        threshold = jnp.pad(threshold, ((0, ps),))

    b_enc2 = b_enc.reshape(1, S_pad)
    thr2 = threshold.reshape(1, S_pad)
    b_dec2 = b_dec.reshape(1, d_model)

    grid = (B_pad // block_b, S_pad // block_s)
    out_is_f32 = out_dtype == jnp.float32
    kernel = _kernel_f32_out if out_is_f32 else _kernel_acc_scratch
    scratch_shapes = ([] if out_is_f32
                      else [pltpu.VMEM((block_b, d_model), jnp.float32)])

    def nbytes(shape, dt):
        return math.prod(shape) * jnp.dtype(dt).itemsize

    # VMEM footprint: double-buffered operands + in-kernel f32 temporaries.
    vmem_est = (
        2 * nbytes((block_b, d_model), x_in.dtype)            # x tile
        + 2 * nbytes((d_model, block_s), w_dtype)             # W_enc tile
        + 2 * nbytes((block_s, d_model), w_dtype)             # W_dec tile
        + 2 * (nbytes((1, block_s), b_enc2.dtype)
               + nbytes((1, block_s), thr2.dtype))
        + 2 * nbytes((1, d_model), b_dec2.dtype)
        + 2 * nbytes((block_b, d_model), out_dtype)           # out tile
        + 2 * nbytes((block_b, block_s), jnp.float32)         # pre + acts temps
        + nbytes((block_b, block_s), w_dtype))                # acts cast for decode
    if not out_is_f32:
        vmem_est += nbytes((block_b, d_model), jnp.float32)   # acc scratch
    vmem_limit = min(declared_cap, max(int(vmem_est * 1.5), 24 * 1024 * 1024))

    # Advisory cost estimate for the XLA scheduler.
    flops = 4 * B_pad * d_model * S_pad                       # encode + decode
    bytes_accessed = int(
        B_pad * d_model * (x_bytes + out_bytes)
        + grid[0] * (w_enc.size + w_dec.size) * w_bytes       # weights / batch tile
        + grid[0] * (b_enc2.size * jnp.dtype(b_enc2.dtype).itemsize
                     + thr2.size * jnp.dtype(thr2.dtype).itemsize)
        + b_dec2.size * jnp.dtype(b_dec2.dtype).itemsize)
    cost = pl.CostEstimate(flops=flops, transcendentals=0,
                           bytes_accessed=bytes_accessed)

    out = pl.pallas_call(
        kernel,
        out_shape=jax.ShapeDtypeStruct((B_pad, d_model), out_dtype),
        grid_spec=pltpu.PrefetchScalarGridSpec(
            num_scalar_prefetch=0,
            grid=grid,
            in_specs=[
                pl.BlockSpec((block_b, d_model), lambda i, k: (i, 0)),   # x
                pl.BlockSpec((d_model, block_s), lambda i, k: (0, k)),   # W_enc
                pl.BlockSpec((1, block_s), lambda i, k: (0, k)),         # b_enc
                pl.BlockSpec((1, block_s), lambda i, k: (0, k)),         # threshold
                pl.BlockSpec((block_s, d_model), lambda i, k: (k, 0)),   # W_dec
                pl.BlockSpec((1, d_model), lambda i, k: (0, 0)),         # b_dec
            ],
            out_specs=pl.BlockSpec((block_b, d_model), lambda i, k: (i, 0)),
            scratch_shapes=scratch_shapes,
        ),
        compiler_params=pltpu.CompilerParams(
            dimension_semantics=("parallel", "arbitrary"),
            vmem_limit_bytes=vmem_limit),
        cost_estimate=cost,
    )(x_in, w_enc, b_enc2, thr2, w_dec, b_dec2)

    return out if B_pad == B else out[:B]


# ---------------------------------------------------------------------------
# Reference + self-test
# ---------------------------------------------------------------------------

def _reference_forward(x, w_enc, b_enc, threshold, w_dec, b_dec):
    pre = x @ w_enc + b_enc
    mask = (pre > threshold).astype(pre.dtype)
    acts = mask * jnp.maximum(pre, 0.0)
    return acts @ w_dec + b_dec


if __name__ == "__main__":
    # Small shapes consistent with the module, large enough to exercise both
    # the batch tiling and the d_sae reduction axis.
    B, d_model, d_sae = 16, 128, 256

    key = jax.random.PRNGKey(0)
    kx, ke, kd, kt, kbe, kbd = jax.random.split(key, 6)

    x = jax.random.normal(kx, (B, d_model), dtype=jnp.float32)
    # Module __init__ uses zeros; use random "trained-like" params so the
    # JumpReLU gating path is actually exercised.
    w_enc = jax.random.normal(ke, (d_model, d_sae), dtype=jnp.float32) * 0.1
    w_dec = jax.random.normal(kd, (d_sae, d_model), dtype=jnp.float32) * 0.1
    threshold = jax.random.uniform(kt, (d_sae,), dtype=jnp.float32) * 0.05
    b_enc = jax.random.normal(kbe, (d_sae,), dtype=jnp.float32) * 0.01
    b_dec = jax.random.normal(kbd, (d_model,), dtype=jnp.float32) * 0.01

    ref = _reference_forward(x, w_enc, b_enc, threshold, w_dec, b_dec)

    # f32 path with explicit small tiles: 2 batch tiles x 2 d_sae tiles.
    out = jumprelu_sae_forward(x, w_enc, b_enc, threshold, w_dec, b_dec,
                               block_b=8, block_s=128)
    out = jax.block_until_ready(out)
    assert out.shape == (B, d_model)
    assert jnp.allclose(out, ref, atol=1e-5, rtol=1e-5), "f32 tiled mismatch"

    # f32 path with auto-selected (VMEM-budget) tiles.
    out_auto = jumprelu_sae_forward(x, w_enc, b_enc, threshold, w_dec, b_dec)
    out_auto = jax.block_until_ready(out_auto)
    assert jnp.allclose(out_auto, ref, atol=1e-5, rtol=1e-5), "f32 auto mismatch"

    # bf16-weight path (wrapper-level cast: halves weight + x HBM traffic,
    # bf16 MXU throughput, f32 accumulation).  Validated against an f32
    # reference of the bf16-rounded params with a loosened tolerance — the
    # gate can flip for pre-activations near the (bf16-rounded) threshold.
    out_bf = jumprelu_sae_forward(x, w_enc, b_enc, threshold, w_dec, b_dec,
                                  weights_dtype=jnp.bfloat16)
    out_bf = jax.block_until_ready(out_bf)
    ref_bf = _reference_forward(
        x.astype(jnp.bfloat16).astype(jnp.float32),
        w_enc.astype(jnp.bfloat16).astype(jnp.float32),
        b_enc.astype(jnp.bfloat16).astype(jnp.float32),
        threshold.astype(jnp.bfloat16).astype(jnp.float32),
        w_dec.astype(jnp.bfloat16).astype(jnp.float32),
        b_dec.astype(jnp.bfloat16).astype(jnp.float32))
    assert out_bf.dtype == x.dtype
    assert jnp.allclose(out_bf, ref_bf, atol=7.5e-2, rtol=7.5e-2), "bf16 mismatch"

    print("KERNEL_OK")
</pallas_src>

<mosaic_0001>
module attributes {stable_mosaic.version = 11 : i64} {
  func.func @_kernel_f32_out(%arg0: i32, %arg1: i32, %arg2: memref<8x128xf32, #tpu.memory_space<vmem>>, %arg3: memref<128x128xf32, #tpu.memory_space<vmem>>, %arg4: memref<1x128xf32, #tpu.memory_space<vmem>>, %arg5: memref<1x128xf32, #tpu.memory_space<vmem>>, %arg6: memref<128x128xf32, #tpu.memory_space<vmem>>, %arg7: memref<1x128xf32, #tpu.memory_space<vmem>>, %arg8: memref<8x128xf32, #tpu.memory_space<vmem>>) attributes {dimension_semantics = [#tpu.dimension_semantics<parallel>, #tpu.dimension_semantics<arbitrary>], iteration_bounds = array<i64: 2, 2>, scalar_prefetch = 0 : i64, scratch_operands = 0 : i64, tpu.core_type = #tpu.core_type<tc>, window_params = [{transform_indices = @transform_0, window_bounds = array<i64: 8, 128>}, {transform_indices = @transform_1, window_bounds = array<i64: 128, 128>}, {transform_indices = @transform_2, window_bounds = array<i64: 1, 128>}, {transform_indices = @transform_3, window_bounds = array<i64: 1, 128>}, {transform_indices = @transform_4, window_bounds = array<i64: 128, 128>}, {pipeline_mode = #tpu.pipeline_mode<synchronous>, transform_indices = @transform_5, window_bounds = array<i64: 1, 128>}, {transform_indices = @transform_6, window_bounds = array<i64: 8, 128>}]} {
    %c0 = arith.constant 0 : index
    %c0_0 = arith.constant 0 : index
    %0 = vector.load %arg2[%c0, %c0_0] : memref<8x128xf32, #tpu.memory_space<vmem>>, vector<8x128xf32>
    %c0_1 = arith.constant 0 : index
    %c0_2 = arith.constant 0 : index
    %1 = vector.load %arg3[%c0_1, %c0_2] : memref<128x128xf32, #tpu.memory_space<vmem>>, vector<128x128xf32>
    %cst = arith.constant dense<0.000000e+00> : vector<8x128xf32>
    %2 = tpu.matmul %0, %1, %cst {dimension_numbers = #tpu.dot_dimension_numbers<[1], [0], [0], [1], [0, 0, 1, 1], [], []>} : vector<8x128xf32>, vector<128x128xf32>, vector<8x128xf32> -> vector<8x128xf32>
    %c0_3 = arith.constant 0 : index
    %c0_4 = arith.constant 0 : index
    %3 = vector.load %arg4[%c0_3, %c0_4] : memref<1x128xf32, #tpu.memory_space<vmem>>, vector<1x128xf32>
    %4 = vector.broadcast %3 : vector<1x128xf32> to vector<8x128xf32>
    %5 = arith.addf %2, %4 : vector<8x128xf32>
    %c0_5 = arith.constant 0 : index
    %c0_6 = arith.constant 0 : index
    %6 = vector.load %arg5[%c0_5, %c0_6] : memref<1x128xf32, #tpu.memory_space<vmem>>, vector<1x128xf32>
    %cst_7 = arith.constant 0.000000e+00 : f32
    %7 = vector.broadcast %cst_7 : f32 to vector<1x128xf32>
    %8 = arith.maximumf %6, %7 : vector<1x128xf32>
    %9 = vector.broadcast %8 : vector<1x128xf32> to vector<8x128xf32>
    %10 = arith.cmpf ogt, %5, %9 : vector<8x128xf32>
    %cst_8 = arith.constant 0.000000e+00 : f32
    %11 = vector.broadcast %cst_8 : f32 to vector<8x128xf32>
    %12 = arith.select %10, %5, %11 : vector<8x128xi1>, vector<8x128xf32>
    %c0_9 = arith.constant 0 : index
    %c0_10 = arith.constant 0 : index
    %13 = vector.load %arg6[%c0_9, %c0_10] : memref<128x128xf32, #tpu.memory_space<vmem>>, vector<128x128xf32>
    %cst_11 = arith.constant dense<0.000000e+00> : vector<8x128xf32>
    %14 = tpu.matmul %12, %13, %cst_11 {dimension_numbers = #tpu.dot_dimension_numbers<[1], [0], [0], [1], [0, 0, 1, 1], [], []>} : vector<8x128xf32>, vector<128x128xf32>, vector<8x128xf32> -> vector<8x128xf32>
    %c0_i32 = arith.constant 0 : i32
    %15 = arith.cmpi eq, %arg1, %c0_i32 : i32
    %16 = arith.extui %15 : i1 to i32
    %c0_i32_12 = arith.constant 0 : i32
    %17 = arith.cmpi ne, %16, %c0_i32_12 : i32
    scf.if %17 {
      %c0_16 = arith.constant 0 : index
      %c0_17 = arith.constant 0 : index
      %24 = vector.load %arg8[%c0_16, %c0_17] : memref<8x128xf32, #tpu.memory_space<vmem>>, vector<8x128xf32>
      tpu.vector_store %arg8[%c0_16, %c0_17], %14 {strides = array<i32>} : memref<8x128xf32, #tpu.memory_space<vmem>>, vector<8x128xf32>,
    } else {
    }
    %c0_i32_13 = arith.constant 0 : i32
    %18 = arith.cmpi sgt, %arg1, %c0_i32_13 : i32
    %19 = arith.extui %18 : i1 to i32
    %c0_i32_14 = arith.constant 0 : i32
    %20 = arith.cmpi ne, %19, %c0_i32_14 : i32
    scf.if %20 {
      %c0_16 = arith.constant 0 : index
      %c0_17 = arith.constant 0 : index
      %24 = vector.load %arg8[%c0_16, %c0_17] : memref<8x128xf32, #tpu.memory_space<vmem>>, vector<8x128xf32>
      %25 = arith.addf %24, %14 : vector<8x128xf32>
      %c0_18 = arith.constant 0 : index
      %c0_19 = arith.constant 0 : index
      %26 = vector.load %arg8[%c0_18, %c0_19] : memref<8x128xf32, #tpu.memory_space<vmem>>, vector<8x128xf32>
      tpu.vector_store %arg8[%c0_18, %c0_19], %25 {strides = array<i32>} : memref<8x128xf32, #tpu.memory_space<vmem>>, vector<8x128xf32>,
    } else {
    }
    %c1_i32 = arith.constant 1 : i32
    %21 = arith.cmpi eq, %arg1, %c1_i32 : i32
    %22 = arith.extui %21 : i1 to i32
    %c0_i32_15 = arith.constant 0 : i32
    %23 = arith.cmpi ne, %22, %c0_i32_15 : i32
    scf.if %23 {
      %c0_16 = arith.constant 0 : index
      %c0_17 = arith.constant 0 : index
      %24 = vector.load %arg8[%c0_16, %c0_17] : memref<8x128xf32, #tpu.memory_space<vmem>>, vector<8x128xf32>
      %c0_18 = arith.constant 0 : index
      %c0_19 = arith.constant 0 : index
      %25 = vector.load %arg7[%c0_18, %c0_19] : memref<1x128xf32, #tpu.memory_space<vmem>>, vector<1x128xf32>
      %26 = vector.broadcast %25 : vector<1x128xf32> to vector<8x128xf32>
      %27 = arith.addf %24, %26 : vector<8x128xf32>
      %c0_20 = arith.constant 0 : index
      %c0_21 = arith.constant 0 : index
      %28 = vector.load %arg8[%c0_20, %c0_21] : memref<8x128xf32, #tpu.memory_space<vmem>>, vector<8x128xf32>
      tpu.vector_store %arg8[%c0_20, %c0_21], %27 {strides = array<i32>} : memref<8x128xf32, #tpu.memory_space<vmem>>, vector<8x128xf32>,
    } else {
    }
    return
  }
  func.func @transform_0(%arg0: i32, %arg1: i32) -> (i32, i32) {
    %c0_i32 = arith.constant 0 : i32
    %c0_i32_0 = arith.constant 0 : i32
    return %arg0, %c0_i32 : i32, i32
  }
  func.func @transform_1(%arg0: i32, %arg1: i32) -> (i32, i32) {
    %c0_i32 = arith.constant 0 : i32
    %c0_i32_0 = arith.constant 0 : i32
    return %c0_i32, %arg1 : i32, i32
  }
  func.func @transform_2(%arg0: i32, %arg1: i32) -> (i32, i32) {
    %c0_i32 = arith.constant 0 : i32
    %c0_i32_0 = arith.constant 0 : i32
    return %c0_i32, %arg1 : i32, i32
  }
  func.func @transform_3(%arg0: i32, %arg1: i32) -> (i32, i32) {
    %c0_i32 = arith.constant 0 : i32
    %c0_i32_0 = arith.constant 0 : i32
    return %c0_i32, %arg1 : i32, i32
  }
  func.func @transform_4(%arg0: i32, %arg1: i32) -> (i32, i32) {
    %c0_i32 = arith.constant 0 : i32
    %c0_i32_0 = arith.constant 0 : i32
    return %arg1, %c0_i32 : i32, i32
  }
  func.func @transform_5(%arg0: i32, %arg1: i32) -> (i32, i32) {
    %c0_i32 = arith.constant 0 : i32
    %c0_i32_0 = arith.constant 0 : i32
    %c0_i32_1 = arith.constant 0 : i32
    return %c0_i32, %c0_i32_0 : i32, i32
  }
  func.func @transform_6(%arg0: i32, %arg1: i32) -> (i32, i32) {
    %c0_i32 = arith.constant 0 : i32
    %c0_i32_0 = arith.constant 0 : i32
    return %arg0, %c0_i32 : i32, i32
  }
}

</mosaic_0001>

<bundles_post_ra>
// kernel: tpu_custom_call.1
= control target key start
LH: loop header
LB: loop body
LE: loop exit
PB: predicated region body
PF: predicated region fallthrough
CT: control target
= control target key end

     0   :  { %s1728_s0 = inlined_call_operand.hbm [shape: f32[16,128], index: 0, kind: input, shape index: {}]   ;;  %s1729_s1 = inlined_call_operand.hbm [shape: f32[128,256], index: 1, kind: input, shape index: {}]   ;;  %s1730_s2 = inlined_call_operand.vmem [shape: f32[1,256], index: 2, kind: input, shape index: {}]   ;;  %s1731_s3 = inlined_call_operand.vmem [shape: f32[1,256], index: 3, kind: input, shape index: {}]   ;;  %s1732_s4 = inlined_call_operand.hbm [shape: f32[256,128], index: 4, kind: input, shape index: {}]   ;;  %s1733_s5 = inlined_call_operand.vmem [shape: f32[1,128], index: 5, kind: input, shape index: {}]   ;;  %s1734_s6 = inlined_call_operand.hbm [shape: f32[16,128], index: 6, kind: output, shape index: {}]  }
   0x1   :  { %1747 = sst [smem:[#allocation19_spill]] %s1729_s1 }
   0x2   :  { %1748 = sst [smem:[#allocation20_spill]] %s1730_s2 }
   0x3   :  { %1749 = sst [smem:[#allocation21_spill]] %s1731_s3 }
   0x4   :  { %1750 = sst [smem:[#allocation22_spill]] %s1733_s5 }
   0x5   :  { %1751 = sst [smem:[#allocation23_spill]] %s1734_s6 }
   0x6   :  { %11 = vsyncpa [#allocation3], 0 }
   0x7   :  { %13 = vsyncpa [#allocation3 + $0x1], 0 }
   0x8   :  { %14 = vsyncpa [#allocation6], 0 }
   0x9   :  { %16 = vsyncpa [#allocation6 + $0x1], 0 }
   0xa   :  { %17 = vsyncpa [#allocation4], 0 }
   0xb   :  { %19 = vsyncpa [#allocation4 + $0x1], 0  ;;  %s1316_s21 = smov 0   ;;  %s1318_s22 = smov 0  }
   0xc   :  { %s1320_s23 = smov 0   ;;  %s1322_s24 = smov 0  }
   0xd   :  { %s1324_s25 = smov 0   ;;  %s1326_s26 = smov 0  }
   0xe   :  { %s1328_s27 = smov 0   ;;  %s1330_s28 = smov 0  }
   0xf   :  { %s1332_s29 = smov 0   ;;  %s1334_s30 = smov 0  }
  0x10   :  { %s1336_s7 = smov 0  }
  0x11 LB: > { %1752 = sst [smem:[#allocation12_spill]] %s1249_s26  ;;  %p52_p0 = scmp.eq.s32.totalorder %s1269_s7, 0  ;;  %s1269_s7 = sphi %s1336_s7, %s25_s7   ;;  %s1265_s30 = sphi %s1334_s30, %s1789_s30   ;;  %s1261_s29 = sphi %s1332_s29, %s1797_s29   ;;  %s1257_s28 = sphi %s1330_s28, %s1796_s28   ;;  %s1253_s27 = sphi %s1328_s27, %s1795_s27   ;;  %s1249_s26 = sphi %s1326_s26, %s1786_s26   ;;  %s1245_s25 = sphi %s1324_s25, %s1794_s25   ;;  %s1241_s24 = sphi %s1322_s24, %s1793_s24   ;;  %s1237_s23 = sphi %s1320_s23, %s1792_s23   ;;  %s1233_s22 = sphi %s1318_s22, %s1791_s22   ;;  %s1229_s21 = sphi %s1316_s21, %s1790_s21  }
  0x12   : > { %1753 = sst [smem:[#allocation13_spill]] %s1257_s28  ;;  %p77_p1 = scmp.ne.s32.totalorder %s1237_s23, %s1233_s22 }
  0x13   : > { %1754 = sst [smem:[#allocation14_spill]] %s1265_s30  ;;  %p1735_p2 = scmp.lt.s32.totalorder %s1269_s7, 4 }
  0x14   : > { %s253_s9 = sand.u32 1, %s1269_s7   ;;  %p79_p3 = por %p77_p1, %p52_p0 }
  0x15   : > { %s255_s10 = sand.u32 1, %s1237_s23   ;;  %s763_s11 = sshll.u32 %s1261_s29, 7 }
  0x16   : > { %s1381_s12 = sshll.u32 %s255_s10, 7  ;;  %s1755_s1 = sld [smem:[#allocation19_spill]] }
  0x17   : > { %p1390_p4 = pnand %p1735_p2, %p79_p3  ;;  %s257_s17 = scalar_lea.vmem [#allocation5], %s1381_s12 }
  0x18   : > { %s263_s18 = sshll.u32 %s257_s17, 4  ;;  %s1397_s19 = scalar_lea.sflag [#allocation6], %s253_s9  ;;  %s1395_s18 = int_to_ptr.vmem [resolvable:$true] %s263_s18 }
  0x19   : > { %p1740_p6 = pneg %p1390_p4 }
  0x1c   : > { %s1386_s15 = scalar_lea.hbm %s1755_s1, %s763_s11  ;;  %s1058_s13 = scalar_lea.hbm %s1755_s1, 4096 }
  0x1d   : > { %s1053_s20 = scalar_lea.hbm %s1386_s15, 2048  ;;  %p1059_p9 = scmp.lt.u32.totalorder %s1386_s15, %s1755_s1 }
  0x1e   : > { %p1054_p5 = scmp.ne.s32.totalorder %s1386_s15, %s1053_s20  ;;  %p1060_p10 = scmp.lt.u32.totalorder %s1058_s13, %s1053_s20 }
  0x1f   : > { %p1062_p12 = scmp.lt.u32.totalorder %s1053_s20, %s1386_s15 }
  0x20   : > { %p1056_p7 = pnand %p1740_p6, %p1054_p5  ;;  %p1061_p11 = por %p1060_p10, %p1059_p9 }
  0x22   : > { %p1057_p8 = pneg %p1056_p7  ;;  %p1063_p13 = por %p1062_p12, %p1061_p11 }
  0x24   : > { %p1064_p1 = pnand %p1063_p13, %p1057_p8 }
  0x26   : > { %1067 = shalt.err (!%p1064_p1)
}
  0x27   : > { %s1068_s9 = scalar_lea.vmem %s1395_s18, 2048  ;;  %s1271_s17 = smov [#allocation5]  }
  0x28   : > { %p1069_p3 = scmp.ne.s32.totalorder %s1395_s18, %s1068_s9  ;;  %s1073_s10 = sshll.u32 %s1271_s17, 4  ;;  %s1074_s10 = int_to_ptr.vmem [resolvable:$false] %s1073_s10 }
  0x29   : > { %s1075_s8 = scalar_lea.vmem %s1074_s10, 4096  ;;  %p1076_p2 = scmp.lt.s32.totalorder %s1395_s18, %s1074_s10 }
  0x2a   : > { %p1071_p5 = pnand %p1069_p3, %p1740_p6  ;;  %p1077_p9 = scmp.lt.s32.totalorder %s1075_s8, %s1068_s9 }
  0x2c   : > { %p1072_p7 = pneg %p1071_p5  ;;  %p1078_p10 = por %p1077_p9, %p1076_p2 }
  0x2e   : > { %p1079_p11 = pnand %p1078_p10, %p1072_p7 }
  0x30   : > { %1082 = shalt.err (!%p1079_p11)
}
  0x31   : > { %s1272_s20 = smov 256   ;;  %s1736_s11 = smov 128  }
  0x32   : > { %s1737_s13 = smov 8   ;;  %p767_p2 = scmp.ge.s32.totalorder %s1269_s7, 1 }
  0x33   : > { %949 = dma.hbm_to_vmem [thread:$0]  (!%p1390_p4), %s1386_s15, 2048, %s1395_s18, %s1397_s19, %s1272_s20, %s1736_s11, %s1737_s13  }
  0x34   : > { %p304_p8 = scmp.lt.s32.totalorder %s1269_s7, 5  ;;  %s1434_s9 = sadd.s32 4294967295, %s1269_s7  }
  0x35   : > { %s757_s17 = sadd.s32 4294967294, %s1269_s7   ;;  %s34_s10 = sadd.s32 1, %s1261_s29 }
  0x36   : > { %p1429_p12 = pnand %p767_p2, %p304_p8  ;;  %p35_p13 = scmp.ge.s32.totalorder %s34_s10, 2 }
  0x37   : > { %s37_s8 = sadd.s32 1, %s1265_s30  ;;  %s44_s15 = sadd.s32 1, %s1249_s26 }
  0x38   : > { %s1757_s14 = scalar_select %p1429_p12, 1, 0 }
  0x39   : > { %p51_p1 = scmp.ne.s32.totalorder %s1249_s26, %s1245_s25  ;;  %s1799_s10 = smov (%p35_p13, %s34_s10), 0 }
  0x3a   : > { %1758 = sst [smem:[#allocation15_spill]] %s1799_s10  ;;  %s1801_s8 = smov (!%p35_p13, %s37_s8), %s1265_s30 }
  0x3b   : > { %p1450_p3 = por %p52_p0, %p51_p1  ;;  %p57_p5 = scmp.ne.s32.totalorder %s1245_s25, %s1241_s24 }
  0x3c   : > { %p39_p7 = scmp.ge.s32.totalorder %s1801_s8, 2  ;;  %p58_p9 = scmp.eq.s32.totalorder %s1434_s9, 0 }
  0x3d   : > { %s67_s20 = ssub.s32 %s1261_s29, %s1799_s10  ;;  %p83_p10 = scmp.ne.s32.totalorder %s1233_s22, %s1229_s21 }
  0x3e   : > { %s1803_s8 = smov (%p39_p7, %s1801_s8), 0  ;;  %p1466_p11 = por %p58_p9, %p57_p5 }
  0x3f   : > { %1760 = sst [smem:[#allocation16_spill]] %s1803_s8  ;;  %p68_p0 = scmp.eq.s32.totalorder %s67_s20, 0 }
  0x40   : > { %s1761_s11 = scalar_select %p1466_p11, 1, 0 }
  0x41   : > { %s41_s13 = ssub.s32 %s1265_s30, %s1803_s8  ;;  %p1472_p2 = por %p83_p10, %p58_p9 }
  0x42   : > { %p42_p8 = scmp.eq.s32.totalorder %s41_s13, 0  ;;  %p206_p13 = scmp.eq.s32.totalorder %s1434_s9, 3 }
  0x43   : > { %s1762_s1 = scalar_select %p1472_p2, 1, 0 }
  0x44   : > { %s1763_s10 = sadd.s32 1, %s1237_s23  ;;  %p1488_p7 = por %p206_p13, %p51_p1 }
  0x45   : > { %s1480_s21 = scalar_select %p68_p0, %s1237_s23, %s1763_s10  }
  0x46   : > { %s1483_s6 = scalar_select %p42_p8, %s1249_s26, %s44_s15  }
  0x47   : > { %1764 = sst [smem:[#allocation17_spill]] %s1480_s21  ;;  %p212_p6 = scmp.eq.s32.totalorder %s757_s17, 3 }
  0x48   : > { %1765 = sst [smem:[#allocation18_spill]] %s1483_s6  ;;  %s235_s5 = sand.u32 1, %s1249_s26  }
  0x49   : > { %s1766_s28 = scalar_select %p1488_p7, 1, 0 }
  0x4a   : > { %s761_s20 = sshll.u32 %s1265_s30, 7  ;;  %p1497_p9 = por %p212_p6, %p57_p5 }
  0x4b   : > { %s760_s13 = sshll.u32 %s235_s5, 3  ;;  %s1504_s10 = scalar_lea.hbm %s1728_s0, %s761_s20 }
  0x4c   : > { %s1767_s8 = scalar_select %p1497_p9, 1, 0 }
  0x4d   : > { %p1768_p10 = scmp.lt.s32.totalorder %s1269_s7, 4  ;;  %s239_s15 = scalar_lea.vmem [#allocation2], %s760_s13 }
  0x4e   : > { %s246_s30 = sshll.u32 %s239_s15, 4  ;;  %s236_s6 = scalar_lea.sflag [#allocation3], %s235_s5  ;;  %s1514_s30 = int_to_ptr.vmem [resolvable:$true] %s246_s30 }
  0x4f   : > { %p1510_p1 = pnand %p1768_p10, %p1450_p3  ;;  %s1083_s2 = scalar_lea.hbm %s1504_s10, 128 }
  0x50   : > { %p1084_p6 = scmp.ne.s32.totalorder %s1504_s10, %s1083_s2  ;;  %s1088_s20 = scalar_lea.hbm %s1728_s0, 256 }
  0x51   : > { %p1085_p5 = pneg %p1510_p1  ;;  %p1089_p3 = scmp.lt.u32.totalorder %s1504_s10, %s1728_s0 }
  0x52   : > { %p1090_p13 = scmp.lt.u32.totalorder %s1088_s20, %s1083_s2  ;;  %p1092_p9 = scmp.lt.u32.totalorder %s1083_s2, %s1504_s10 }
  0x53   : > { %p1086_p0 = pnand %p1085_p5, %p1084_p6 }
  0x54   : > { %p1091_p10 = por %p1090_p13, %p1089_p3 }
  0x55   : > { %p1087_p8 = pneg %p1086_p0 }
  0x56   : > { %p1093_p7 = por %p1092_p9, %p1091_p10 }
  0x58   : > { %p1094_p2 = pnand %p1093_p7, %p1087_p8 }
  0x5a   : > { %1097 = shalt.err (!%p1094_p2)
}
  0x5b   : > { %s1098_s5 = scalar_lea.vmem %s1514_s30, 128  ;;  %s1275_s13 = smov [#allocation2]  }
  0x5c   : > { %p1099_p6 = scmp.ne.s32.totalorder %s1514_s30, %s1098_s5  ;;  %s1103_s15 = sshll.u32 %s1275_s13, 4  ;;  %s1104_s15 = int_to_ptr.vmem [resolvable:$false] %s1103_s15 }
  0x5d   : > { %s1105_s26 = scalar_lea.vmem %s1104_s15, 256  ;;  %p1106_p12 = scmp.lt.s32.totalorder %s1514_s30, %s1104_s15 }
  0x5e   : > { %p1101_p0 = pnand %p1099_p6, %p1085_p5  ;;  %p1107_p3 = scmp.lt.s32.totalorder %s1105_s26, %s1098_s5 }
  0x60   : > { %p1102_p11 = pneg %p1101_p0  ;;  %p1108_p13 = por %p1107_p3, %p1106_p12 }
  0x62   : > { %p1109_p9 = pnand %p1108_p13, %p1102_p11 }
  0x64   : > { %1112 = shalt.err (!%p1109_p9)
}
  0x65   : > { %946 = dma.hbm_to_vmem [thread:$0]  (!%p1510_p1), %s1504_s10, 128, %s1514_s30, %s236_s6  }
  0x66   : > { %s782_s21 = sshll.u32 %s1261_s29, 11  ;;  %s289_s2 = scalar_lea.vmem [#allocation7], %s1381_s12 }
  0x67   : > { %s296_s3 = sshll.u32 %s289_s2, 4  ;;  %s1546_s13 = scalar_lea.hbm %s1732_s4, %s782_s21  ;;  %s1548_s3 = int_to_ptr.vmem [resolvable:$true] %s296_s3 }
  0x68   : > { %s1113_s17 = scalar_lea.hbm %s1546_s13, 2048  ;;  %p1770_p11 = pneg %p1390_p4 }
  0x69   : > { %p1114_p12 = scmp.ne.s32.totalorder %s1546_s13, %s1113_s17  ;;  %s1118_s12 = scalar_lea.hbm %s1732_s4, 4096 }
  0x6a   : > { %p1119_p1 = scmp.lt.u32.totalorder %s1546_s13, %s1732_s4  ;;  %p1120_p5 = scmp.lt.u32.totalorder %s1118_s12, %s1113_s17 }
  0x6b   : > { %p1116_p2 = pnand %p1114_p12, %p1770_p11  ;;  %p1122_p10 = scmp.lt.u32.totalorder %s1113_s17, %s1546_s13 }
  0x6c   : > { %p1121_p8 = por %p1120_p5, %p1119_p1 }
  0x6d   : > { %p1117_p7 = pneg %p1116_p2 }
  0x6e   : > { %p1123_p6 = por %p1122_p10, %p1121_p8 }
  0x70   : > { %p1124_p0 = pnand %p1123_p6, %p1117_p7 }
  0x72   : > { %1127 = shalt.err (!%p1124_p0)
}
  0x73   : > { %s1128_s15 = scalar_lea.vmem %s1548_s3, 2048  ;;  %p1771_p13 = pmov %p1770_p11 }
  0x74   : > { %p1129_p3 = scmp.ne.s32.totalorder %s1548_s3, %s1128_s15  ;;  %s1276_s26 = smov [#allocation7]  }
  0x75   : > { %s1133_s21 = sshll.u32 %s1276_s26, 4  ;;  %s1134_s21 = int_to_ptr.vmem [resolvable:$false] %s1133_s21 }
  0x76   : > { %p1131_p9 = pnand %p1129_p3, %p1771_p13  ;;  %s1135_s2 = scalar_lea.vmem %s1134_s21, 4096 }
  0x77   : > { %p1136_p11 = scmp.lt.s32.totalorder %s1548_s3, %s1134_s21  ;;  %p1137_p2 = scmp.lt.s32.totalorder %s1135_s2, %s1128_s15 }
  0x78   : > { %p1132_p12 = pneg %p1131_p9 }
  0x79   : > { %p1138_p1 = por %p1137_p2, %p1136_p11 }
  0x7b   : > { %p1139_p5 = pnand %p1138_p1, %p1132_p12 }
  0x7d   : > { %1142 = shalt.err (!%p1139_p5)
}
  0x7e   : > { %s1772_s18 = smov 8   ;;  %s1773_s20 = smov 128  }
  0x7f   : > { %952 = dma.hbm_to_vmem [thread:$0]  (!%p1390_p4), %s1546_s13, 2048, %s1548_s3, %s1397_s19, %s1773_s20, %s1773_s20, %s1772_s18  }
  0x80   : > { %p1774_p7 = scmp.ne.s32.totalorder %s1757_s14, 0 }
  0x81   : > { %s1580_s17 = sand.u32 (!%p1774_p7), 1, %s1245_s25   ;;  %p1775_p8 = scmp.ne.s32.totalorder (!%p1774_p7), %s1761_s11, 0 }
  0x82   : > { %308 = sbr.rel (%p1774_p7) target bundleno = 653 (0x28d), region = 44  ;;  %s768_s6 = sshll.u32 (!%p1774_p7), %s1580_s17, 3 }
  0x83   : > { %s311_s30 = scalar_lea.sflag (!%p1774_p7), [#allocation3], %s1580_s17  ;;  %s1586_s16 = scalar_lea.vmem (!%p1774_p7), [#allocation2], %s768_s6 }
  0x89   : > { %1216 = dma.done.wait (%p1775_p8), %s311_s30, 128  }
  0x8a   : > { %1218 = vsyncadd (%p1775_p8), %s311_s30, 4294967168  ;;  %s319_s19 = sand.u32 1, %s1434_s9   ;;  %s321_s14 = sand.u32 1, %s1233_s22  }
  0x8b   : > { %s769_s3 = sshll.u32 %s321_s14, 7  ;;  %s320_s13 = scalar_lea.sflag [#allocation6], %s319_s19 }
  0x8c   : > { %s1594_s12 = scalar_lea.vmem [#allocation5], %s769_s3  ;;  %p1776_p4 = scmp.ne.s32.totalorder %s1762_s1, 0 }
  0x8e   : > { %1220 = dma.done.wait (%p1776_p4), %s320_s13, 4096  }
  0x8f   : > { %1222 = vsyncadd (%p1776_p4), %s320_s13, 4294963200  ;;  %v1277_v0 = vmov 0.0|0.0   ;;  %vm1278_vm0 = vmmov 0   ;;  %v1279_v1 = vmov 0.0   ;;  %v385_v2 = vld [vmem:[%s1594_s12] sm:$0xff]  ;;  %v386_v3 = vld [vmem:[%s1594_s12 + $0x8] sm:$0xff]  ;;  %v481_v51 = vlaneseq }
  0x90   : > { %887 = vmatprep.subr.bf16.mxu0 %v1277_v0  ;;  %849 = vmatprep.mubr.msk.f32.mxu0 %vm1278_vm0, %v1279_v1  ;;  %v387_v4 = vld [vmem:[%s1594_s12 + $0x10] sm:$0xff]  ;;  %v888_v5 = vpack.c.bf16 %v386_v3, %v385_v2  ;;  %v388_v6 = vld [vmem:[%s1594_s12 + $0x18] sm:$0xff]  ;;  %v389_v8 = vld [vmem:[%s1594_s12 + $0x20] sm:$0xff]  ;;  %s1609_s1 = scalar_lea.vmem [#allocation7], %s769_s3  ;;  %p377_p10 = scmp.lt.s32.totalorder %s1253_s27, 1 }
  0x91   : > { %911 = vmatprep.subr.bf16.mxu1 %v1277_v0  ;;  %884 = vmatprep.mubr.msk.f32.mxu1 %vm1278_vm0, %v1279_v1  ;;  %v891_v7 = vpack.c.bf16 %v388_v6, %v387_v4  ;;  %v390_v9 = vld [vmem:[%s1594_s12 + $0x28] sm:$0xff]  ;;  %v488_v10 = vld [vmem:[%s1609_s1] sm:$0xff]  ;;  %v490_v12 = vld [vmem:[%s1609_s1 + $0x10] sm:$0xff]  ;;  %s1777_s5 = sld [smem:[#allocation21_spill]]  ;;  %v482_v52 = vshrl.u32 %v481_v51, 7  ;;  %s1778_s2 = sld [smem:[#allocation20_spill]] }
  0x92   : > { %889 = vmatpush3.bf16.msra.mxu0 %v888_v5  ;;  %v489_v11 = vld [vmem:[%s1609_s1 + $0x8] sm:$0xff]  ;;  %v491_v13 = vld [vmem:[%s1609_s1 + $0x18] sm:$0xff]  ;;  %v894_v14 = vpack.c.bf16 %v390_v9, %v389_v8  ;;  %v391_v16 = vld [vmem:[%s1594_s12 + $0x30] sm:$0xff]  ;;  %s378_s11 = scalar_select %p377_p10, %s1253_s27, 1 }
  0x93   : > { %890 = vmatprep.subr.bf16.mxu0 %v1277_v0  ;;  %v912_v15 = vpack.c.bf16 %v489_v11, %v488_v10  ;;  %v392_v17 = vld [vmem:[%s1594_s12 + $0x38] sm:$0xff]  ;;  %v915_v18 = vpack.c.bf16 %v491_v13, %v490_v12  ;;  %v492_v19 = vld [vmem:[%s1609_s1 + $0x20] sm:$0xff]  ;;  %v493_v20 = vld [vmem:[%s1609_s1 + $0x28] sm:$0xff]  ;;  %v483_v55 = vsub.s32 0, %v482_v52  ;;  %s376_s20 = scalar_lea.vmem [#allocation8], %s768_s6  ;;  %p774_p6 = scmp.ne.s32.totalorder %s1253_s27, 0 }
  0x94   : > { %v897_v21 = vpack.c.bf16 %v392_v17, %v391_v16  ;;  %v393_v22 = vld [vmem:[%s1594_s12 + $0x40] sm:$0xff]  ;;  %v394_v23 = vld [vmem:[%s1594_s12 + $0x48] sm:$0xff]  ;;  %v918_v24 = vpack.c.bf16 %v493_v20, %v492_v19  ;;  %v494_v25 = vld [vmem:[%s1609_s1 + $0x30] sm:$0xff] }
  0x95   : > { %913 = vmatpush3.bf16.msra.mxu1 %v912_v15  ;;  %v495_v26 = vld [vmem:[%s1609_s1 + $0x38] sm:$0xff]  ;;  %v900_v27 = vpack.c.bf16 %v394_v23, %v393_v22  ;;  %v395_v28 = vld [vmem:[%s1594_s12 + $0x50] sm:$0xff]  ;;  %v496_v31 = vld [vmem:[%s1609_s1 + $0x40] sm:$0xff] }
  0x96   : > { %892 = vmatpush3.bf16.msra.mxu0 %v891_v7  ;;  %914 = vmatprep.subr.bf16.mxu1 %v1277_v0  ;;  %v396_v29 = vld [vmem:[%s1594_s12 + $0x58] sm:$0xff]  ;;  %v921_v30 = vpack.c.bf16 %v495_v26, %v494_v25  ;;  %v497_v32 = vld [vmem:[%s1609_s1 + $0x48] sm:$0xff]  ;;  %v397_v34 = vld [vmem:[%s1594_s12 + $0x60] sm:$0xff] }
  0x97   : > { %893 = vmatprep.subr.bf16.mxu0 %v1277_v0  ;;  %v903_v33 = vpack.c.bf16 %v396_v29, %v395_v28  ;;  %v398_v35 = vld [vmem:[%s1594_s12 + $0x68] sm:$0xff]  ;;  %v924_v36 = vpack.c.bf16 %v497_v32, %v496_v31  ;;  %v498_v37 = vld [vmem:[%s1609_s1 + $0x50] sm:$0xff]  ;;  %v499_v38 = vld [vmem:[%s1609_s1 + $0x58] sm:$0xff]  ;;  %s382_s15 = scalar_lea.vmem %s1777_s5, %s378_s11  ;;  %s379_s18 = scalar_lea.vmem %s1778_s2, %s378_s11 }
  0x98   : > { %v906_v39 = vpack.c.bf16 %v398_v35, %v397_v34  ;;  %v399_v40 = vld [vmem:[%s1594_s12 + $0x70] sm:$0xff]  ;;  %v400_v41 = vld [vmem:[%s1594_s12 + $0x78] sm:$0xff]  ;;  %v927_v42 = vpack.c.bf16 %v499_v38, %v498_v37  ;;  %v500_v43 = vld [vmem:[%s1609_s1 + $0x60] sm:$0xff] }
  0x99   : > { %916 = vmatpush3.bf16.msra.mxu1 %v915_v18  ;;  %v501_v44 = vld [vmem:[%s1609_s1 + $0x68] sm:$0xff]  ;;  %v909_v45 = vpack.c.bf16 %v400_v41, %v399_v40  ;;  %v384_v47 = vld [vmem:[%s1586_s16] sm:$0xff] }
  0x9a   : > { %895 = vmatpush3.bf16.msra.mxu0 %v894_v14  ;;  %917 = vmatprep.subr.bf16.mxu1 %v1277_v0  ;;  %v930_v46 = vpack.c.bf16 %v501_v44, %v500_v43  ;;  %v502_v48 = vld [vmem:[%s1609_s1 + $0x70] sm:$0xff]  ;;  %v503_v49 = vld [vmem:[%s1609_s1 + $0x78] sm:$0xff] }
  0x9b   : > { %896 = vmatprep.subr.bf16.mxu0 %v1277_v0  ;;  %v933_v50 = vpack.c.bf16 %v503_v49, %v502_v48  ;;  %v478_v53 = vld [vmem:[%s382_s15] sm:$0x1] }
  0x9c   : > { %v479_v54 = vmax.f32 %v478_v53, 0.0  ;;  %v772_v56 = vld [vmem:[%s379_s18] ss:$0 sm:$0xff] }
  0x9d   : > { %919 = vmatpush3.bf16.msra.mxu1 %v918_v24 }
  0x9e   : > { %898 = vmatpush3.bf16.msra.mxu0 %v897_v21  ;;  %920 = vmatprep.subr.bf16.mxu1 %v1277_v0  ;;  %v484_v57 = vrot.slane %v479_v54, %v483_v55 }
  0x9f   : > { %899 = vmatprep.subr.bf16.mxu0 %v1277_v0 }
  0xa1   : > { %922 = vmatpush3.bf16.msra.mxu1 %v921_v30 }
  0xa2   : > { %901 = vmatpush3.bf16.msra.mxu0 %v900_v27  ;;  %923 = vmatprep.subr.bf16.mxu1 %v1277_v0 }
  0xa3   : > { %902 = vmatprep.subr.bf16.mxu0 %v1277_v0 }
  0xa5   : > { %925 = vmatpush3.bf16.msra.mxu1 %v924_v36 }
  0xa6   : > { %904 = vmatpush3.bf16.msra.mxu0 %v903_v33  ;;  %926 = vmatprep.subr.bf16.mxu1 %v1277_v0 }
  0xa7   : > { %905 = vmatprep.subr.bf16.mxu0 %v1277_v0 }
  0xa9   : > { %928 = vmatpush3.bf16.msra.mxu1 %v927_v42 }
  0xaa   : > { %907 = vmatpush3.bf16.msra.mxu0 %v906_v39  ;;  %929 = vmatprep.subr.bf16.mxu1 %v1277_v0 }
  0xab   : > { %908 = vmatprep.subr.bf16.mxu0 %v1277_v0 }
  0xad   : > { %931 = vmatpush3.bf16.msra.mxu1 %v930_v46 }
  0xae   : > { %910 = vmatpush3.bf16.msra.mxu0 %v909_v45  ;;  %932 = vmatprep.subr.bf16.mxu1 %v1277_v0 }
  0xb1   : > { %850 = vmatmul.mubr.f32.vlgmr.msra.gmra.mrb[0].mxu0 %v384_v47  ;;  %934 = vmatpush3.bf16.msra.mxu1 %v933_v50 }
 0x184   : > { %v474_v58 = vpop.f32.mrb[0].mxu0 }
 0x185   : > { %v475_v59 = vadd.f32 %v772_v56, %v474_v58  ;;  %v851_v60 = vpop.f32.mrb[1].mxu0 }
 0x187   : > { %vm486_vm1 = vcmp.gt.f32.partialorder %v475_v59, %v484_v57 }
 0x188   : > { %885 = vmatmul.mubr.msk.f32.vlgmr.msra.gmra.mrb[0].mxu1 %vm486_vm1, %v475_v59 }
 0x256   : > { %577 = sbr.rel (%p774_p6) target bundleno = 605 (0x25d), region = 60 }
 0x25b   : > { %v570_v61 = vpop.f32.mrb[0].mxu1 }
 0x25c   : > { %v886_v62 = vpop.f32.mrb[1].mxu1  ;;  %578 = vst [vmem:[%s376_s20] sm:$0xff] (!%p774_p6), %v570_v61 }
 0x25d PF: > { %p775_p0 = scmp.le.s32.totalorder %s1253_s27, 0 }
 0x25f   : > { %582 = sbr.rel (%p775_p0) target bundleno = 615 (0x267), region = 64 }
 0x263   : > { %v583_v63 = vld [vmem:[%s376_s20] sm:$0xff] (!%p775_p0) }
 0x264   : > { %v584_v0 = vadd.f32 (!%p775_p0), %v583_v63, %v570_v61 }
 0x266   : > { %585 = vst [vmem:[%s376_s20] sm:$0xff] %v584_v0 }
 0x267 PF: > { %p776_p3 = scmp.ne.s32.totalorder %s1253_s27, 1 }
 0x268   : > { %s1779_s19 = sld [smem:[#allocation22_spill]] (!%p776_p3) }
 0x269   : > { %589 = sbr.rel (%p776_p3) target bundleno = 626 (0x272), region = 68 }
 0x26d   : > { %v590_v1 = vld [vmem:[%s376_s20] sm:$0xff] (!%p776_p3) }
 0x26e   : > { %v777_v2 = vld [vmem:[%s1779_s19] ss:$0 sm:$0xff] (!%p776_p3) }
 0x26f   : > { %v598_v3 = vadd.f32 (!%p776_p3), %v777_v2, %v590_v1 }
 0x271   : > { %599 = vst [vmem:[%s376_s20] sm:$0xff] %v598_v3 }
 0x272 PF: > { %s1780_s6 = sld [smem:[#allocation13_spill]]  ;;  %s1781_s12 = sld [smem:[#allocation23_spill]] }
 0x273   : > { %s614_s11 = sshll.u32 %s376_s20, 4  ;;  %s601_s27 = scalar_lea.sflag [#allocation4], %s1580_s17  ;;  %s615_s11 = int_to_ptr.vmem [resolvable:$true] %s614_s11 }
 0x274   : > { %s1143_s9 = scalar_lea.vmem %s615_s11, 128  ;;  %p1782_p9 = scmp.ne.s32.totalorder %s1766_s28, 0 }
 0x275   : > { %p1144_p13 = scmp.ne.s32.totalorder %s615_s11, %s1143_s9  ;;  %s1280_s10 = smov [#allocation8]  }
 0x276   : > { %s1147_s5 = sshll.u32 %s1280_s10, 4  ;;  %s1148_s5 = int_to_ptr.vmem [resolvable:$false] %s1147_s5 }
 0x277   : > { %p1145_p12 = pnand %p1144_p13, %p1782_p9  ;;  %s1149_s15 = scalar_lea.vmem %s1148_s5, 256 }
 0x278   : > { %s779_s14 = sshll.u32 %s1780_s6, 7  ;;  %p1150_p2 = scmp.lt.s32.totalorder %s615_s11, %s1148_s5 }
 0x279   : > { %s1671_s1 = scalar_lea.hbm %s1781_s12, %s779_s14  ;;  %p1146_p11 = pneg %p1145_p12 }
 0x27a   : > { %p1151_p1 = scmp.lt.s32.totalorder %s1149_s15, %s1143_s9 }
 0x27c   : > { %p1152_p5 = por %p1151_p1, %p1150_p2 }
 0x27e   : > { %p1153_p7 = pnand %p1152_p5, %p1146_p11 }
 0x280   : > { %1156 = shalt.err (!%p1153_p7)
}
 0x281   : > { %s1157_s17 = scalar_lea.hbm %s1671_s1, 128  ;;  %s1161_s2 = scalar_lea.hbm %s1781_s12, 256 }
 0x282   : > { %p1158_p8 = scmp.ne.s32.totalorder %s1671_s1, %s1157_s17  ;;  %p1162_p6 = scmp.lt.u32.totalorder %s1671_s1, %s1781_s12 }
 0x283   : > { %p1163_p0 = scmp.lt.u32.totalorder %s1161_s2, %s1157_s17  ;;  %p1165_p13 = scmp.lt.u32.totalorder %s1157_s17, %s1671_s1 }
 0x284   : > { %p1159_p4 = pnand %p1158_p8, %p1782_p9 }
 0x285   : > { %p1164_p3 = por %p1163_p0, %p1162_p6 }
 0x286   : > { %p1160_p10 = pneg %p1159_p4 }
 0x287   : > { %p1166_p12 = por %p1165_p13, %p1164_p3 }
 0x289   : > { %p1167_p11 = pnand %p1166_p12, %p1160_p10 }
 0x28b   : > { %1170 = shalt.err (!%p1167_p11)
}
 0x28c   : > { %941 = dma.vmem_to_hbm [thread:$0]  (%p1782_p9), %s615_s11, 128, %s1671_s1, %s601_s27  }
 0x28d PF: > { %p958_p2 = scmp.ge.s32.totalorder %s1269_s7, 2  ;;  %s626_s30 = sand.u32 1, %s1241_s24  }
 0x28e   : > { %p1783_p1 = scmp.ne.s32.totalorder %s1767_s8, 0  ;;  %s627_s16 = scalar_lea.sflag [#allocation4], %s626_s30 }
 0x290   : > { %p954_p5 = pnand %p958_p2, %p1783_p1 }
 0x292   : > { %1224 = dma.done.wait (!%p954_p5), %s627_s16, 128  }
 0x293   : > { %1226 = vsyncadd (!%p954_p5), %s627_s16, 4294967168  ;;  %s25_s7 = sadd.s32 1, %s1269_s7   ;;  %s1784_s19 = sld [smem:[#allocation17_spill]] }
 0x294   : > { %p22_p7 = scmp.ge.s32.totalorder %s25_s7, 6   ;;  %s1785_s28 = sld [smem:[#allocation12_spill]] }
 0x295   : > { %s1786_s26 = sld [smem:[#allocation18_spill]]  ;;  %s1787_s6 = sld [smem:[#allocation14_spill]] }
 0x296   : > { %s1788_s14 = sld [smem:[#allocation15_spill]]  ;;  %s1789_s30 = sld [smem:[#allocation16_spill]] }
 0x297   : > { %s1790_s21 = smov %s1233_s22  ;;  %s1791_s22 = smov %s1237_s23 }
 0x298   : > { %s1793_s24 = smov %s1245_s25  ;;  %s1795_s27 = smov %s1261_s29 }
 0x299   : > { %s1792_s23 = smov %s1784_s19  ;;  %24 = sbr.rel (!%p22_p7) target bundleno = 17 (0x11), region = 131 }
 0x29a   : > { %s1794_s25 = smov %s1785_s28 }
 0x29b   : > { %s1796_s28 = smov %s1787_s6 }
 0x29c   : > { %s1797_s29 = smov %s1788_s14 }
 0x2a0   :  { %632 = vsyncpa [#allocation3], 1 }
 0x2a1   :  { %634 = vsyncpa [#allocation3 + $0x1], 1 }
 0x2a2   :  { %635 = vsyncpa [#allocation6], 1 }
 0x2a3   :  { %637 = vsyncpa [#allocation6 + $0x1], 1 }
 0x2a4   :  { %638 = vsyncpa [#allocation4], 1 }
 0x2a5   :  { %640 = vsyncpa [#allocation4 + $0x1], 1 }

</bundles_post_ra>
